<compile_context>
chip_gen: v7x
topology: tpu7x:2x2x1
jax: 0.10.0
libtpu: 0.0.40
codegen_flags: <defaults>
</compile_context>

<pallas_src>
import math
from functools import partial

import jax
import jax.numpy as jnp
import numpy as np
from jax import lax
from jax.experimental import pallas as pl
from jax.experimental.pallas import tpu as pltpu


# --------------------------- generation-aware VMEM ----------------------------

def _vmem_limit_bytes():
    try:
        cap = pltpu.get_tpu_info().vmem_capacity_bytes
        return int(cap * 3 // 4)          # ~96 MiB on v5e/v6e, ~48 MiB on v7x
    except Exception:
        return 48 * 1024 * 1024


VMEM_LIMIT = _vmem_limit_bytes()


# ----------------------------- shared math ------------------------------------

def _layernorm(x, w, b, eps=1e-5):
    mu = jnp.mean(x, axis=-1, keepdims=True)
    var = jnp.mean((x - mu) ** 2, axis=-1, keepdims=True)
    return (x - mu) * lax.rsqrt(var + eps) * w + b


def _gelu_exact(x):
    # PyTorch nn.GELU() default (approximate='none'): 0.5*x*(1+erf(x/sqrt(2)))
    return 0.5 * x * (1.0 + lax.erf(x * (1.0 / math.sqrt(2.0))))


def _largest_tile(n, candidates):
    for c in candidates:
        if n % c == 0:
            return c
    return n


def _pick_vocab_tile(v):
    best = None
    for c in (4096, 3072, 2048, 1536, 1024, 768, 512, 384, 256, 128):
        if v % c == 0:
            if best is None:
                best = c
            if v // c >= 2:            # >=2 tiles so both v7x cores get work
                return c
    return best if best is not None else v


# ----------------------------- Pallas kernels ----------------------------------

def qkv_kernel(x_ref, ln1w_ref, ln1b_ref, wqkv_ref, bqkv_ref, out_ref):
    """LN1 + fused full-width QKV projection (scale pre-folded into Q weights)."""
    h = _layernorm(x_ref[...], ln1w_ref[...], ln1b_ref[...])
    qkv = jnp.dot(h.astype(jnp.bfloat16), wqkv_ref[...],
                  preferred_element_type=jnp.float32) + bqkv_ref[...]
    out_ref[...] = qkv.astype(out_ref.dtype)


def flash_attn_kernel(q_ref, k_ref, v_ref, o_ref, m_scr, l_scr, acc_scr):
    """Causal flash attention for one (batch*head, q-tile); online softmax over
    kv tiles (innermost, 'arbitrary' grid axis)."""
    qi = pl.program_id(1)
    ki = pl.program_id(2)
    nk = pl.num_programs(2)
    tq = q_ref.shape[1]
    tk = k_ref.shape[1]

    @pl.when(ki == 0)
    def _():
        m_scr[...] = jnp.full_like(m_scr, -jnp.inf)
        l_scr[...] = jnp.zeros_like(l_scr)
        acc_scr[...] = jnp.zeros_like(acc_scr)

    # Skip kv tiles strictly above the causal diagonal (fully masked).
    @pl.when(ki * tk <= qi * tq + (tq - 1))
    def _():
        q = q_ref[0]                                        # (tq, hd) bf16 (pre-scaled)
        k = k_ref[0]                                        # (tk, hd) bf16
        s = lax.dot_general(q, k, (((1,), (1,)), ((), ())),
                            preferred_element_type=jnp.float32)   # (tq, tk)
        row = qi * tq + lax.broadcasted_iota(jnp.int32, (tq, tk), 0)
        col = ki * tk + lax.broadcasted_iota(jnp.int32, (tq, tk), 1)
        s = jnp.where(col <= row, s, -jnp.inf)

        m_prev = m_scr[...]
        m_new = jnp.maximum(m_prev, jnp.max(s, axis=-1, keepdims=True))
        alpha = jnp.exp(m_prev - m_new)
        p = jnp.exp(s - m_new)
        l_scr[...] = alpha * l_scr[...] + jnp.sum(p, axis=-1, keepdims=True)
        acc_scr[...] = alpha * acc_scr[...] + jnp.dot(
            p.astype(jnp.bfloat16), v_ref[0], preferred_element_type=jnp.float32)
        m_scr[...] = m_new

    @pl.when(ki == nk - 1)
    def _():
        o_ref[0] = (acc_scr[...] / l_scr[...]).astype(o_ref.dtype)


def proj_mlp_kernel(x_ref, y_ref, wo_ref, bo_ref, ln2w_ref, ln2b_ref,
                    wfc_ref, bfc_ref, wmp_ref, bmp_ref, out_ref):
    """attn out-proj + residual + LN2 + fc + GELU + proj + residual.
    Weights are resident (constant index_map); the (TR, 4C) GELU intermediate
    never leaves VMEM."""
    x = x_ref[...]
    a = jnp.dot(y_ref[...], wo_ref[...],
                preferred_element_type=jnp.float32) + bo_ref[...]
    x1 = x + a
    h = _layernorm(x1, ln2w_ref[...], ln2b_ref[...]).astype(jnp.bfloat16)
    f = jnp.dot(h, wfc_ref[...], preferred_element_type=jnp.float32) + bfc_ref[...]
    g = _gelu_exact(f)
    out = x1 + jnp.dot(g.astype(jnp.bfloat16), wmp_ref[...],
                       preferred_element_type=jnp.float32) + bmp_ref[...]
    out_ref[...] = out.astype(out_ref.dtype)


def head_kernel(h_ref, wte_t_ref, out_ref):
    """lm_head matmul for one lane-dense vocab tile (ln_f done in wrapper)."""
    out_ref[...] = jnp.dot(h_ref[...], wte_t_ref[...],
                           preferred_element_type=jnp.float32)


# ----------------------------- wrappers -----------------------------------------

_ROW_TILES = (512, 256, 128, 64, 32, 16, 8)


def run_qkv(x2, blk):
    rows, C = x2.shape
    C3 = blk['w_qkv'].shape[1]
    TR = _largest_tile(rows, _ROW_TILES)
    return pl.pallas_call(
        qkv_kernel,
        out_shape=jax.ShapeDtypeStruct((rows, C3), jnp.bfloat16),
        grid=(rows // TR,),
        in_specs=[
            pl.BlockSpec((TR, C), lambda r: (r, 0)),
            pl.BlockSpec((1, C), lambda r: (0, 0)),
            pl.BlockSpec((1, C), lambda r: (0, 0)),
            pl.BlockSpec((C, C3), lambda r: (0, 0)),     # resident weight
            pl.BlockSpec((1, C3), lambda r: (0, 0)),
        ],
        out_specs=pl.BlockSpec((TR, C3), lambda r: (r, 0)),
        compiler_params=pltpu.CompilerParams(
            dimension_semantics=("parallel",),
            vmem_limit_bytes=VMEM_LIMIT),
    )(x2, blk['ln1_w'], blk['ln1_b'], blk['w_qkv'], blk['b_qkv'])


def run_flash_attn(q, k, v):
    BH, T, hd = q.shape
    TQ = _largest_tile(T, (256, 128, 64, 32, 16, 8))
    TK = TQ
    grid = (BH, T // TQ, T // TK)
    return pl.pallas_call(
        flash_attn_kernel,
        out_shape=jax.ShapeDtypeStruct((BH, T, hd), jnp.bfloat16),
        grid=grid,
        in_specs=[
            pl.BlockSpec((1, TQ, hd), lambda bh, qi, ki: (bh, qi, 0)),
            pl.BlockSpec((1, TK, hd), lambda bh, qi, ki: (bh, ki, 0)),
            pl.BlockSpec((1, TK, hd), lambda bh, qi, ki: (bh, ki, 0)),
        ],
        out_specs=pl.BlockSpec((1, TQ, hd), lambda bh, qi, ki: (bh, qi, 0)),
        scratch_shapes=[
            pltpu.VMEM((TQ, 1), jnp.float32),     # running max m
            pltpu.VMEM((TQ, 1), jnp.float32),     # running denom l
            pltpu.VMEM((TQ, hd), jnp.float32),    # running numerator acc
        ],
        compiler_params=pltpu.CompilerParams(
            dimension_semantics=("parallel", "parallel", "arbitrary"),
            vmem_limit_bytes=VMEM_LIMIT),
    )(q, k, v)


def run_proj_mlp(x2, y2, blk):
    rows, C = x2.shape
    H4 = blk['w_fc'].shape[1]
    TR = _largest_tile(rows, _ROW_TILES)
    const2 = lambda r: (0, 0)
    return pl.pallas_call(
        proj_mlp_kernel,
        out_shape=jax.ShapeDtypeStruct((rows, C), x2.dtype),
        grid=(rows // TR,),
        in_specs=[
            pl.BlockSpec((TR, C), lambda r: (r, 0)),       # x (f32 residual)
            pl.BlockSpec((TR, C), lambda r: (r, 0)),       # y (bf16 attn out)
            pl.BlockSpec((C, C), const2),                  # wo   (resident)
            pl.BlockSpec((1, C), const2),                  # bo
            pl.BlockSpec((1, C), const2),                  # ln2 w
            pl.BlockSpec((1, C), const2),                  # ln2 b
            pl.BlockSpec((C, H4), const2),                 # w_fc (resident)
            pl.BlockSpec((1, H4), const2),                 # b_fc
            pl.BlockSpec((H4, C), const2),                 # w_mproj (resident)
            pl.BlockSpec((1, C), const2),                  # b_mproj
        ],
        out_specs=pl.BlockSpec((TR, C), lambda r: (r, 0)),
        input_output_aliases={0: 0},                       # in-place residual
        compiler_params=pltpu.CompilerParams(
            dimension_semantics=("parallel",),
            vmem_limit_bytes=VMEM_LIMIT),
    )(x2, y2, blk['w_aproj'], blk['b_aproj'], blk['ln2_w'], blk['ln2_b'],
      blk['w_fc'], blk['b_fc'], blk['w_mproj'], blk['b_mproj'])


def run_head(h_last, wte_t):
    B, C = h_last.shape
    V = wte_t.shape[1]
    TV = _pick_vocab_tile(V)
    try:   # 3-deep buffering on the weight stream (pure HBM-streaming matmul)
        wte_spec = pl.BlockSpec((C, TV), lambda v: (0, v),
                                pipeline_mode=pl.Buffered(3))
    except TypeError:
        wte_spec = pl.BlockSpec((C, TV), lambda v: (0, v))
    return pl.pallas_call(
        head_kernel,
        out_shape=jax.ShapeDtypeStruct((B, V), jnp.float32),
        grid=(V // TV,),
        in_specs=[pl.BlockSpec((B, C), lambda v: (0, 0)), wte_spec],
        out_specs=pl.BlockSpec((B, TV), lambda v: (0, v)),
        compiler_params=pltpu.CompilerParams(
            dimension_semantics=("parallel",),
            vmem_limit_bytes=VMEM_LIMIT),
    )(h_last, wte_t)


def gpt_forward(idx, kparams, n_head):
    # targets=None, kv_cache=None path of GPT.forward -> (logits, loss=None)
    B, T = idx.shape
    C = kparams['wpe'].shape[1]
    H = n_head
    hd = C // H
    x = kparams['wte'][idx] + kparams['wpe'][:T][None]       # f32 residual stream
    x2 = x.reshape(B * T, C)
    for blk in kparams['blocks']:
        qkv = run_qkv(x2, blk)                               # (B*T, 3C) bf16
        qkv = qkv.reshape(B, T, 3, H, hd)                    # wrapper layout plumbing
        q = qkv[:, :, 0].transpose(0, 2, 1, 3).reshape(B * H, T, hd)
        k = qkv[:, :, 1].transpose(0, 2, 1, 3).reshape(B * H, T, hd)
        v = qkv[:, :, 2].transpose(0, 2, 1, 3).reshape(B * H, T, hd)
        y = run_flash_attn(q, k, v)                          # (B*H, T, hd) bf16
        y2 = y.reshape(B, H, T, hd).transpose(0, 2, 1, 3).reshape(B * T, C)
        x2 = run_proj_mlp(x2, y2, blk)                       # residual updated in place
    x_last = x2.reshape(B, T, C)[:, -1, :]                   # slice BEFORE head
    # ln_f on (B, C) is tiny; done once in the wrapper so the vocab-tiled head
    # kernel never recomputes it per tile.
    h_last = _layernorm(x_last, kparams['lnf_w'], kparams['lnf_b']).astype(jnp.bfloat16)
    logits = run_head(h_last, kparams['wte_t'])
    V = logits.shape[-1]
    return logits.reshape(B, 1, V), None


# --------------------------- pure-JAX reference ----------------------------------
# Same mixed-precision policy as the kernels (bf16 matmul operands, f32 accum).

def _bf16_mm(a, w):
    return jnp.dot(a.astype(jnp.bfloat16), w.astype(jnp.bfloat16),
                   preferred_element_type=jnp.float32)


def _block_ref(x, blk, n_head):
    B, T, C = x.shape
    hd = C // n_head
    h = _layernorm(x, blk['ln1_w'], blk['ln1_b'])
    qkv = _bf16_mm(h, blk['w_qkv']) + blk['b_qkv']
    q, k, v = qkv[..., :C], qkv[..., C:2 * C], qkv[..., 2 * C:]
    q = q.reshape(B, T, n_head, hd).transpose(0, 2, 1, 3)
    k = k.reshape(B, T, n_head, hd).transpose(0, 2, 1, 3)
    v = v.reshape(B, T, n_head, hd).transpose(0, 2, 1, 3)
    att = jnp.einsum('bhtd,bhsd->bhts',
                     (q / math.sqrt(hd)).astype(jnp.bfloat16),
                     k.astype(jnp.bfloat16),
                     preferred_element_type=jnp.float32)
    mask = jnp.tril(jnp.ones((T, T), bool))
    att = jnp.where(mask[None, None], att, -jnp.inf)
    att = jax.nn.softmax(att, axis=-1)
    y = jnp.einsum('bhts,bhsd->bhtd', att.astype(jnp.bfloat16),
                   v.astype(jnp.bfloat16), preferred_element_type=jnp.float32)
    y = y.transpose(0, 2, 1, 3).reshape(B, T, C)
    x = x + _bf16_mm(y, blk['w_aproj']) + blk['b_aproj']
    h2 = _layernorm(x, blk['ln2_w'], blk['ln2_b'])
    f = _gelu_exact(_bf16_mm(h2, blk['w_fc']) + blk['b_fc'])
    return x + _bf16_mm(f, blk['w_mproj']) + blk['b_mproj']


def gpt_forward_ref(idx, params, n_head):
    B, T = idx.shape
    x = params['wte'][idx] + params['wpe'][:T][None]
    for blk in params['blocks']:
        x = _block_ref(x, blk, n_head)
    x = _layernorm(x, params['lnf_w'], params['lnf_b'])
    return _bf16_mm(x[:, -1, :], params['wte'].T)[:, None, :]


# ----------------------------- parameter init ------------------------------------

def init_params(key, *, vocab, block_size, n_layer, n_head, n_embd):
    C = n_embd
    std = 0.02
    proj_std = 0.02 / math.sqrt(2 * n_layer)
    keys = iter(jax.random.split(key, 4 + 4 * n_layer))
    nrm = lambda k, shp, s: (jax.random.normal(k, shp, jnp.float32) * s)

    params = {
        'wte': nrm(next(keys), (vocab, C), std),
        'wpe': nrm(next(keys), (block_size, C), std),
        'lnf_w': jnp.ones((1, C), jnp.float32),
        'lnf_b': jnp.zeros((1, C), jnp.float32),
        'blocks': [],
    }
    for _ in range(n_layer):
        params['blocks'].append({
            'ln1_w': jnp.ones((1, C), jnp.float32),
            'ln1_b': jnp.zeros((1, C), jnp.float32),
            'w_qkv': nrm(next(keys), (C, 3 * C), std),
            'b_qkv': jnp.zeros((1, 3 * C), jnp.float32),
            'w_aproj': nrm(next(keys), (C, C), proj_std),
            'b_aproj': jnp.zeros((1, C), jnp.float32),
            'ln2_w': jnp.ones((1, C), jnp.float32),
            'ln2_b': jnp.zeros((1, C), jnp.float32),
            'w_fc': nrm(next(keys), (C, 4 * C), std),
            'b_fc': jnp.zeros((1, 4 * C), jnp.float32),
            'w_mproj': nrm(next(keys), (4 * C, C), proj_std),
            'b_mproj': jnp.zeros((1, C), jnp.float32),
        })
    return params


def prepare_kernel_params(params, n_head):
    """One-time repack: bf16 matmul weights, 1/sqrt(hd) folded into the Q
    columns of w_qkv/b_qkv, pre-transposed tied embedding for the lm_head."""
    def conv_block(blk):
        C = blk['w_qkv'].shape[0]
        hd = C // n_head
        scale = 1.0 / math.sqrt(hd)
        col_scale = jnp.concatenate(
            [jnp.full((C,), scale, jnp.float32), jnp.ones((2 * C,), jnp.float32)])
        return {
            'ln1_w': blk['ln1_w'], 'ln1_b': blk['ln1_b'],
            'w_qkv': (blk['w_qkv'] * col_scale[None, :]).astype(jnp.bfloat16),
            'b_qkv': blk['b_qkv'] * col_scale[None, :],
            'w_aproj': blk['w_aproj'].astype(jnp.bfloat16),
            'b_aproj': blk['b_aproj'],
            'ln2_w': blk['ln2_w'], 'ln2_b': blk['ln2_b'],
            'w_fc': blk['w_fc'].astype(jnp.bfloat16), 'b_fc': blk['b_fc'],
            'w_mproj': blk['w_mproj'].astype(jnp.bfloat16),
            'b_mproj': blk['b_mproj'],
        }

    return {
        'wte': params['wte'],
        'wpe': params['wpe'],
        'wte_t': params['wte'].T.astype(jnp.bfloat16),   # tied lm_head weight
        'lnf_w': params['lnf_w'], 'lnf_b': params['lnf_b'],
        'blocks': [conv_block(b) for b in params['blocks']],
    }


# ----------------------------------- main -----------------------------------------

if __name__ == "__main__":
    # small GPTConfig-consistent shapes
    VOCAB, BLOCK_SIZE, N_LAYER, N_HEAD, N_EMBD = 512, 64, 2, 4, 128
    B, T = 2, 8

    key = jax.random.PRNGKey(0)
    k_params, k_idx = jax.random.split(key)
    params = init_params(k_params, vocab=VOCAB, block_size=BLOCK_SIZE,
                         n_layer=N_LAYER, n_head=N_HEAD, n_embd=N_EMBD)
    kparams = prepare_kernel_params(params, N_HEAD)
    idx = jax.random.randint(k_idx, (B, T), 0, VOCAB, dtype=jnp.int32)

    logits, loss = gpt_forward(idx, kparams, N_HEAD)
    logits = jax.block_until_ready(logits)
    assert logits.shape == (B, 1, VOCAB) and loss is None

    ref = jax.block_until_ready(gpt_forward_ref(idx, params, N_HEAD))
    np.testing.assert_allclose(np.asarray(logits), np.asarray(ref),
                               rtol=2e-2, atol=2e-2)

    print("KERNEL_OK")
</pallas_src>

<mosaic_0001>
module attributes {stable_mosaic.version = 11 : i64} {
  func.func @qkv_kernel(%arg0: i32, %arg1: memref<16x128xf32, #tpu.memory_space<vmem>>, %arg2: memref<1x128xf32, #tpu.memory_space<vmem>>, %arg3: memref<1x128xf32, #tpu.memory_space<vmem>>, %arg4: memref<128x384xbf16, #tpu.memory_space<vmem>>, %arg5: memref<1x384xf32, #tpu.memory_space<vmem>>, %arg6: memref<16x384xbf16, #tpu.memory_space<vmem>>) attributes {dimension_semantics = [#tpu.dimension_semantics<parallel>], iteration_bounds = array<i64: 1>, scalar_prefetch = 0 : i64, scratch_operands = 0 : i64, tpu.core_type = #tpu.core_type<tc>, window_params = [{transform_indices = @transform_0, window_bounds = array<i64: 16, 128>}, {pipeline_mode = #tpu.pipeline_mode<synchronous>, transform_indices = @transform_1, window_bounds = array<i64: 1, 128>}, {pipeline_mode = #tpu.pipeline_mode<synchronous>, transform_indices = @transform_2, window_bounds = array<i64: 1, 128>}, {pipeline_mode = #tpu.pipeline_mode<synchronous>, transform_indices = @transform_3, window_bounds = array<i64: 128, 384>}, {pipeline_mode = #tpu.pipeline_mode<synchronous>, transform_indices = @transform_4, window_bounds = array<i64: 1, 384>}, {transform_indices = @transform_5, window_bounds = array<i64: 16, 384>}]} {
    %c0 = arith.constant 0 : index
    %c0_0 = arith.constant 0 : index
    %0 = vector.load %arg1[%c0, %c0_0] : memref<16x128xf32, #tpu.memory_space<vmem>>, vector<16x128xf32>
    %c0_1 = arith.constant 0 : index
    %c0_2 = arith.constant 0 : index
    %1 = vector.load %arg2[%c0_1, %c0_2] : memref<1x128xf32, #tpu.memory_space<vmem>>, vector<1x128xf32>
    %c0_3 = arith.constant 0 : index
    %c0_4 = arith.constant 0 : index
    %2 = vector.load %arg3[%c0_3, %c0_4] : memref<1x128xf32, #tpu.memory_space<vmem>>, vector<1x128xf32>
    %cst = arith.constant dense<0.000000e+00> : vector<16xf32>
    %3 = vector.multi_reduction <add>, %0, %cst [1] : vector<16x128xf32> to vector<16xf32>
    %4 = vector.shape_cast %3 : vector<16xf32> to vector<16x1xf32>
    %cst_5 = arith.constant 1.280000e+02 : f32
    %5 = vector.broadcast %cst_5 : f32 to vector<16x1xf32>
    %6 = arith.divf %4, %5 : vector<16x1xf32>
    %7 = vector.broadcast %6 : vector<16x1xf32> to vector<16x128xf32>
    %8 = arith.subf %0, %7 : vector<16x128xf32>
    %9 = arith.mulf %8, %8 : vector<16x128xf32>
    %cst_6 = arith.constant dense<0.000000e+00> : vector<16xf32>
    %10 = vector.multi_reduction <add>, %9, %cst_6 [1] : vector<16x128xf32> to vector<16xf32>
    %11 = vector.shape_cast %10 : vector<16xf32> to vector<16x1xf32>
    %cst_7 = arith.constant 1.280000e+02 : f32
    %12 = vector.broadcast %cst_7 : f32 to vector<16x1xf32>
    %13 = arith.divf %11, %12 : vector<16x1xf32>
    %14 = vector.broadcast %6 : vector<16x1xf32> to vector<16x128xf32>
    %15 = arith.subf %0, %14 : vector<16x128xf32>
    %cst_8 = arith.constant 9.99999974E-6 : f32
    %16 = vector.broadcast %cst_8 : f32 to vector<16x1xf32>
    %17 = arith.addf %13, %16 : vector<16x1xf32>
    %18 = math.rsqrt %17 : vector<16x1xf32>
    %19 = vector.broadcast %18 : vector<16x1xf32> to vector<16x128xf32>
    %20 = arith.mulf %15, %19 : vector<16x128xf32>
    %21 = vector.broadcast %1 : vector<1x128xf32> to vector<16x128xf32>
    %22 = arith.mulf %20, %21 : vector<16x128xf32>
    %23 = vector.broadcast %2 : vector<1x128xf32> to vector<16x128xf32>
    %24 = arith.addf %22, %23 : vector<16x128xf32>
    %25 = arith.truncf %24 : vector<16x128xf32> to vector<16x128xbf16>
    %c0_9 = arith.constant 0 : index
    %c0_10 = arith.constant 0 : index
    %26 = vector.load %arg4[%c0_9, %c0_10] : memref<128x384xbf16, #tpu.memory_space<vmem>>, vector<128x384xbf16>
    %cst_11 = arith.constant dense<0.000000e+00> : vector<16x384xf32>
    %27 = tpu.matmul %25, %26, %cst_11 {dimension_numbers = #tpu.dot_dimension_numbers<[1], [0], [0], [1], [0, 0, 1, 1], [], []>} : vector<16x128xbf16>, vector<128x384xbf16>, vector<16x384xf32> -> vector<16x384xf32>
    %c0_12 = arith.constant 0 : index
    %c0_13 = arith.constant 0 : index
    %28 = vector.load %arg5[%c0_12, %c0_13] : memref<1x384xf32, #tpu.memory_space<vmem>>, vector<1x384xf32>
    %29 = vector.broadcast %28 : vector<1x384xf32> to vector<16x384xf32>
    %30 = arith.addf %27, %29 : vector<16x384xf32>
    %31 = arith.truncf %30 : vector<16x384xf32> to vector<16x384xbf16>
    %c0_14 = arith.constant 0 : index
    %c0_15 = arith.constant 0 : index
    %32 = vector.load %arg6[%c0_14, %c0_15] : memref<16x384xbf16, #tpu.memory_space<vmem>>, vector<16x384xbf16>
    tpu.vector_store %arg6[%c0_14, %c0_15], %31 {strides = array<i32>} : memref<16x384xbf16, #tpu.memory_space<vmem>>, vector<16x384xbf16>,
    return
  }
  func.func @transform_0(%arg0: i32) -> (i32, i32) {
    %c0_i32 = arith.constant 0 : i32
    %c0_i32_0 = arith.constant 0 : i32
    return %arg0, %c0_i32 : i32, i32
  }
  func.func @transform_1(%arg0: i32) -> (i32, i32) {
    %c0_i32 = arith.constant 0 : i32
    %c0_i32_0 = arith.constant 0 : i32
    %c0_i32_1 = arith.constant 0 : i32
    return %c0_i32, %c0_i32_0 : i32, i32
  }
  func.func @transform_2(%arg0: i32) -> (i32, i32) {
    %c0_i32 = arith.constant 0 : i32
    %c0_i32_0 = arith.constant 0 : i32
    %c0_i32_1 = arith.constant 0 : i32
    return %c0_i32, %c0_i32_0 : i32, i32
  }
  func.func @transform_3(%arg0: i32) -> (i32, i32) {
    %c0_i32 = arith.constant 0 : i32
    %c0_i32_0 = arith.constant 0 : i32
    %c0_i32_1 = arith.constant 0 : i32
    return %c0_i32, %c0_i32_0 : i32, i32
  }
  func.func @transform_4(%arg0: i32) -> (i32, i32) {
    %c0_i32 = arith.constant 0 : i32
    %c0_i32_0 = arith.constant 0 : i32
    %c0_i32_1 = arith.constant 0 : i32
    return %c0_i32, %c0_i32_0 : i32, i32
  }
  func.func @transform_5(%arg0: i32) -> (i32, i32) {
    %c0_i32 = arith.constant 0 : i32
    %c0_i32_0 = arith.constant 0 : i32
    return %arg0, %c0_i32 : i32, i32
  }
}

</mosaic_0001>

<bundles_post_ra>
// kernel: tpu_custom_call.1
= control target key start
LH: loop header
LB: loop body
LE: loop exit
PB: predicated region body
PF: predicated region fallthrough
CT: control target
= control target key end

     0   :  { %10 = vsyncpa [#allocation3], 0  ;;  %s688_s0 = inlined_call_operand.hbm [shape: f32[16,128], index: 0, kind: input, shape index: {}]   ;;  %s689_s1 = inlined_call_operand.vmem [shape: f32[1,128], index: 1, kind: input, shape index: {}]   ;;  %s690_s2 = inlined_call_operand.vmem [shape: f32[1,128], index: 2, kind: input, shape index: {}]   ;;  %s691_s3 = inlined_call_operand.hbm [shape: bf16[128,384], index: 3, kind: input, shape index: {}]   ;;  %s692_s4 = inlined_call_operand.vmem [shape: f32[1,384], index: 4, kind: input, shape index: {}]   ;;  %s693_s5 = inlined_call_operand.hbm [shape: bf16[16,384], index: 5, kind: output, shape index: {}]  }
   0x1   :  { %11 = vsyncpa [#allocation6], 0 }
   0x2   :  { %12 = vsyncpa [#allocation4], 0  ;;  %s578_s18 = smov [#allocation2]   ;;  %s506_s22 = scalar_lea.hbm %s688_s0, 256 }
   0x3   :  { %s18_s19 = sshll.u32 %s578_s18, 4  ;;  %p507_p0 = scmp.ne.s32.totalorder %s688_s0, %s506_s22  ;;  %s19_s19 = int_to_ptr.vmem [resolvable:$true] %s18_s19 }
   0x4   :  { %p510_p1 = scmp.lt.u32.totalorder %s506_s22, %s688_s0 }
   0x6   :  { %p512_p2 = pnand %p510_p1, %p507_p0 }
   0x8   :  { %515 = shalt.err (!%p512_p2)
}
   0x9   :  { %s516_s27 = scalar_lea.vmem %s19_s19, 256  ;;  %p521_p4 = scmp.lt.s32.totalorder %s19_s19, %s19_s19 }
   0xa   :  { %p517_p3 = scmp.ne.s32.totalorder %s19_s19, %s516_s27  ;;  %p522_p5 = scmp.lt.s32.totalorder %s516_s27, %s516_s27 }
   0xc   :  { %p523_p6 = por %p522_p5, %p521_p4 }
   0xe   :  { %p524_p7 = pnand %p523_p6, %p517_p3 }
  0x10   :  { %527 = shalt.err (!%p524_p7)
}
  0x11   :  { %s579_s28 = smov 128   ;;  %s580_s29 = smov 8  }
  0x12   :  { %24 = dma.hbm_to_vmem [thread:$0]  %s688_s0, 256, %s19_s19, [#allocation3], %s579_s28, %s579_s28, %s580_s29  }
  0x13   :  { %s581_s7 = smov [#allocation5]   ;;  %s528_s11 = scalar_lea.hbm %s691_s3, 3072 }
  0x14   :  { %s34_s8 = sshll.u32 %s581_s7, 4  ;;  %p529_p8 = scmp.ne.s32.totalorder %s691_s3, %s528_s11  ;;  %s35_s8 = int_to_ptr.vmem [resolvable:$true] %s34_s8 }
  0x15   :  { %p532_p9 = scmp.lt.u32.totalorder %s528_s11, %s691_s3 }
  0x17   :  { %p534_p10 = pnand %p532_p9, %p529_p8 }
  0x19   :  { %537 = shalt.err (!%p534_p10)
}
  0x1a   :  { %s538_s16 = scalar_lea.vmem %s35_s8, 3072  ;;  %p543_p12 = scmp.lt.s32.totalorder %s35_s8, %s35_s8 }
  0x1b   :  { %p539_p11 = scmp.ne.s32.totalorder %s35_s8, %s538_s16  ;;  %p544_p13 = scmp.lt.s32.totalorder %s538_s16, %s538_s16 }
  0x1d   :  { %p545_p0 = por %p544_p13, %p543_p12 }
  0x1f   :  { %p546_p1 = pnand %p545_p0, %p539_p11 }
  0x21   :  { %549 = shalt.err (!%p546_p1)
}
  0x22   :  { %s582_s0 = smov 192   ;;  %s583_s17 = smov 12  }
  0x23   :  { %40 = dma.hbm_to_vmem [thread:$0]  %s691_s3, 3072, %s35_s8, [#allocation6], %s582_s0, %s582_s0, %s583_s17  }
  0x24   :  { %572 = dma.done.wait [#allocation3], 256  }
  0x25   :  { %573 = vsyncadd [#allocation3], 4294967040 }
  0x26   :  { %574 = dma.done.wait [#allocation6], 3072  }
  0x27   :  { %575 = vsyncadd [#allocation6], 4294964224  ;;  %v50_v0 = vld [vmem:[#allocation2] sm:$0xff]  ;;  %v51_v1 = vld [vmem:[#allocation2 + $0x8] sm:$0xff]  ;;  %v584_v4 = vmov 0.0   ;;  %v585_v30 = vmov 0   ;;  %v128_v53 = vlaneseq }
  0x28   :  { %54 = vadd.xlane.f32.xlu0 %v50_v0  ;;  %v470_v2 = vld [vmem:[#allocation5 + $0x4] ss:$12 sps:$4 sm:$0xff]   ;;  %v472_v3 = vld [vmem:[#allocation5] ss:$12 sps:$4 sm:$0xff]   ;;  %440 = vmatprep.subr.bf16.mxu1 %v584_v4  ;;  %v473_v5 = vld [vmem:[#allocation5 + $0x8] ss:$12 sps:$4 sm:$0xff]  }
  0x29   :  { %v474_v6 = vld [vmem:[#allocation5 + $0x1c] ss:$12 sps:$4 sm:$0xff]   ;;  %271 = vmatprep.subr.bf16.mxu0 %v470_v2  ;;  %441 = vmatpush3.bf16.msra.mxu1 %v473_v5  ;;  %v476_v15 = vld [vmem:[#allocation5 + $0x18] ss:$12 sps:$4 sm:$0xff]   ;;  %v477_v16 = vld [vmem:[#allocation5 + $0x20] ss:$12 sps:$4 sm:$0xff]  }
  0x2a   :  { %272 = vmatpush1.bf16.msra.mxu0 %v472_v3  ;;  %442 = vmatprep.subr.bf16.mxu1 %v584_v4  ;;  %v478_v17 = vld [vmem:[#allocation5 + $0x34] ss:$12 sps:$4 sm:$0xff]   ;;  %v480_v18 = vld [vmem:[#allocation5 + $0x30] ss:$12 sps:$4 sm:$0xff]   ;;  %v481_v19 = vld [vmem:[#allocation5 + $0x38] ss:$12 sps:$4 sm:$0xff]  }
  0x2b   :  { %273 = vmatprep.subr.bf16.mxu0 %v474_v6  ;;  %v482_v20 = vld [vmem:[#allocation5 + $0x4c] ss:$12 sps:$4 sm:$0xff]   ;;  %v484_v21 = vld [vmem:[#allocation5 + $0x48] ss:$12 sps:$4 sm:$0xff]   ;;  %v485_v22 = vld [vmem:[#allocation5 + $0x50] ss:$12 sps:$4 sm:$0xff]   ;;  %303 = vmatprep.mubr.bf16.mxu0 %v585_v30 }
  0x2c   :  { %56 = vadd.xlane.f32.xlu0 %v51_v1  ;;  %v486_v23 = vld [vmem:[#allocation5 + $0x64] ss:$12 sps:$4 sm:$0xff]   ;;  %v488_v24 = vld [vmem:[#allocation5 + $0x60] ss:$12 sps:$4 sm:$0xff]   ;;  %v489_v25 = vld [vmem:[#allocation5 + $0x68] ss:$12 sps:$4 sm:$0xff]  }
  0x2d   :  { %443 = vmatpush3.bf16.msra.mxu1 %v477_v16  ;;  %v490_v26 = vld [vmem:[#allocation5 + $0x7c] ss:$12 sps:$4 sm:$0xff]   ;;  %v492_v27 = vld [vmem:[#allocation5 + $0x78] ss:$12 sps:$4 sm:$0xff]   ;;  %v493_v28 = vld [vmem:[#allocation5 + $0x80] ss:$12 sps:$4 sm:$0xff]  }
  0x2e   :  { %274 = vmatpush1.bf16.msra.mxu0 %v476_v15  ;;  %444 = vmatprep.subr.bf16.mxu1 %v584_v4  ;;  %v494_v29 = vld [vmem:[#allocation5 + $0x94] ss:$12 sps:$4 sm:$0xff]   ;;  %vm586_vm0 = vmmov 0   ;;  %v496_v31 = vld [vmem:[#allocation5 + $0x90] ss:$12 sps:$4 sm:$0xff]   ;;  %v129_v54 = vshrl.u32 %v128_v53, 7 }
  0x2f   :  { %275 = vmatprep.subr.bf16.mxu0 %v478_v17  ;;  %456 = vmatprep.mubr.msk.bf16.mxu1 %vm586_vm0, %v584_v4  ;;  %v497_v32 = vld [vmem:[#allocation5 + $0x98] ss:$12 sps:$4 sm:$0xff]   ;;  %v500_v34 = vld [vmem:[#allocation5 + $0xa8] ss:$12 sps:$4 sm:$0xff]   ;;  %v501_v35 = vld [vmem:[#allocation5 + $0xb0] ss:$12 sps:$4 sm:$0xff]  }
  0x30   :  { %v498_v33 = vld [vmem:[#allocation5 + $0xac] ss:$12 sps:$4 sm:$0xff]   ;;  %v397_v44 = vld [vmem:[%s689_s1] ss:$0 sm:$0xff]  ;;  %v130_v55 = vsub.s32 0, %v129_v54  ;;  %v138_v56 = vsub.s32 2, %v129_v54 }
  0x31   :  { %445 = vmatpush3.bf16.msra.mxu1 %v481_v19  ;;  %v398_v48 = vld [vmem:[%s690_s2] ss:$0 sm:$0xff]  ;;  %v134_v58 = vsub.s32 1, %v129_v54  ;;  %s587_s2 = smov [#allocation7]  }
  0x32   :  { %276 = vmatpush1.bf16.msra.mxu0 %v480_v18  ;;  %446 = vmatprep.subr.bf16.mxu1 %v584_v4  ;;  %v126_v57 = vld [vmem:[%s692_s4] sm:$0x7]  ;;  %s384_s4 = sshll.u32 %s587_s2, 4  ;;  %s385_s4 = int_to_ptr.vmem [resolvable:$true] %s384_s4 }
  0x33   :  { %277 = vmatprep.subr.bf16.mxu0 %v482_v20  ;;  %v131_v59 = vrot.slane %v126_v57, %v130_v55  ;;  %v139_v60 = vrot.slane %v126_v57, %v138_v56  ;;  %v135_v61 = vrot.slane %v126_v57, %v134_v58  ;;  %s550_s24 = scalar_lea.vmem %s385_s4, 384  ;;  %p555_p3 = scmp.lt.s32.totalorder %s385_s4, %s385_s4 }
  0x34   :  { %p551_p2 = scmp.ne.s32.totalorder %s385_s4, %s550_s24  ;;  %p556_p4 = scmp.lt.s32.totalorder %s550_s24, %s550_s24 }
  0x35   :  { %447 = vmatpush3.bf16.msra.mxu1 %v485_v22 }
  0x36   :  { %278 = vmatpush1.bf16.msra.mxu0 %v484_v21  ;;  %448 = vmatprep.subr.bf16.mxu1 %v584_v4  ;;  %p557_p5 = por %p556_p4, %p555_p3 }
  0x37   :  { %279 = vmatprep.subr.bf16.mxu0 %v486_v23 }
  0x38   :  { %p558_p6 = pnand %p557_p5, %p551_p2 }
  0x39   :  { %449 = vmatpush3.bf16.msra.mxu1 %v489_v25 }
  0x3a   :  { %280 = vmatpush1.bf16.msra.mxu0 %v488_v24  ;;  %450 = vmatprep.subr.bf16.mxu1 %v584_v4 }
  0x3b   :  { %281 = vmatprep.subr.bf16.mxu0 %v490_v26 }
  0x3d   :  { %451 = vmatpush3.bf16.msra.mxu1 %v493_v28 }
  0x3e   :  { %282 = vmatpush1.bf16.msra.mxu0 %v492_v27  ;;  %452 = vmatprep.subr.bf16.mxu1 %v584_v4 }
  0x3f   :  { %283 = vmatprep.subr.bf16.mxu0 %v494_v29 }
  0x41   :  { %453 = vmatpush3.bf16.msra.mxu1 %v497_v32 }
  0x42   :  { %284 = vmatpush1.bf16.msra.mxu0 %v496_v31  ;;  %454 = vmatprep.subr.bf16.mxu1 %v584_v4 }
  0x43   :  { %285 = vmatprep.subr.bf16.mxu0 %v498_v33 }
  0x45   :  { %455 = vmatpush3.bf16.msra.mxu1 %v501_v35 }
  0x46   :  { %286 = vmatpush1.bf16.msra.mxu0 %v500_v34 }
  0xb5   :  { %v55_v7 = vpop.xlane.xlu0 %54 }
  0xb6   :  { %v59_v8 = vmul.f32 0.0078125, %v55_v7 }
  0xb8   :  { %v647_v9 = vsub.f32 %v50_v0, %v59_v8 }
  0xb9   :  { %v57_v10 = vpop.xlane.xlu0 %56 }
  0xba   :  { %v60_v11 = vmul.f32 0.0078125, %v57_v10  ;;  %v63_v12 = vmul.f32 %v647_v9, %v647_v9 }
  0xbc   :  { %v651_v13 = vsub.f32 %v51_v1, %v60_v11  ;;  %65 = vadd.xlane.f32.xlu1 %v63_v12 }
  0xbe   :  { %v64_v14 = vmul.f32 %v651_v13, %v651_v13 }
  0xc0   :  { %67 = vadd.xlane.f32.xlu1 %v64_v14 }
 0x149   :  { %v66_v36 = vpop.xlane.xlu1 %65 }
 0x14a   :  { %v69_v37 = vmul.f32 0.0078125, %v66_v36 }
 0x14c   :  { %v71_v38 = vadd.f32 1e-05, %v69_v37 }
 0x14d   :  { %v68_v39 = vpop.xlane.xlu1 %67 }
 0x14e   :  { %502 = vrsqrt.f32 %v71_v38  ;;  %v70_v40 = vmul.f32 0.0078125, %v68_v39 }
 0x150   :  { %v72_v41 = vadd.f32 1e-05, %v70_v40 }
 0x152   :  { %504 = vrsqrt.f32 %v72_v41 }
 0x158   :  { %v503_v42 = vpop.eup %502 }
 0x159   :  { %v75_v43 = vmul.f32 %v503_v42, %v647_v9 }
 0x15b   :  { %v83_v47 = vmul.f32 %v397_v44, %v75_v43 }
 0x15c   :  { %v505_v45 = vpop.eup %504 }
 0x15d   :  { %v76_v46 = vmul.f32 %v505_v45, %v651_v13  ;;  %v91_v50 = vadd.f32 %v398_v48, %v83_v47 }
 0x15f   :  { %v84_v49 = vmul.f32 %v397_v44, %v76_v46 }
 0x161   :  { %v92_v51 = vadd.f32 %v398_v48, %v84_v49 }
 0x163   :  { %v93_v52 = vpack.c.bf16 %v92_v51, %v91_v50 }
 0x165   :  { %304 = vmatmul.mubr.bf16.vlgmr.msra.gmra.mrb[0].mxu0 %v93_v52  ;;  %457 = vmatmul.mubr.bf16.vlgmr.msra.gmra.mrb[0].mxu1 %v93_v52 }
 0x238   :  { %v305_v62 = vpop.f32.mrb[0].mxu0  ;;  %v348_v63 = vpop.f32.mrb[0].mxu1 }
 0x239   :  { %v306_v0 = vadd.f32 %v305_v62, %v131_v59  ;;  %v349_v1 = vadd.f32 %v348_v63, %v139_v60  ;;  %v307_v2 = vpop.f32.mrb[1].mxu0  ;;  %v458_v3 = vpop.f32.mrb[1].mxu1 }
 0x23a   :  { %v308_v4 = vadd.f32 %v307_v2, %v135_v61  ;;  %v309_v5 = vpop.f32.mrb[2].mxu0  ;;  %v351_v6 = vpop.f32.mrb[2].mxu1 }
 0x23b   :  { %v428_v7 = vpack.c.bf16 %v349_v1, %v349_v1  ;;  %v310_v8 = vadd.f32 %v309_v5, %v131_v59  ;;  %v352_v9 = vadd.f32 %v351_v6, %v139_v60  ;;  %v311_v10 = vpop.f32.mrb[3].mxu0  ;;  %v459_v11 = vpop.f32.mrb[3].mxu1 }
 0x23c   :  { %v427_v12 = vpack.c.bf16 %v308_v4, %v306_v0  ;;  %v312_v13 = vadd.f32 %v311_v10, %v135_v61 }
 0x23d   :  { %376 = vst [vmem:[#allocation7 + $0x8] sm:$0xf] %v428_v7  ;;  %v430_v14 = vpack.c.bf16 %v352_v9, %v352_v9 }
 0x23e   :  { %375 = vst [vmem:[#allocation7] sm:$0xff] %v427_v12  ;;  %v429_v15 = vpack.c.bf16 %v312_v13, %v310_v8 }
 0x23f   :  { %378 = vst [vmem:[#allocation7 + $0x14] sm:$0xf] %v430_v14 }
 0x240   :  { %377 = vst [vmem:[#allocation7 + $0xc] sm:$0xff] %v429_v15 }
 0x241   :  { %561 = shalt.err (!%p558_p6)
}
 0x242   :  { %s562_s27 = scalar_lea.hbm %s693_s5, 384 }
 0x243   :  { %p563_p7 = scmp.ne.s32.totalorder %s693_s5, %s562_s27  ;;  %p566_p8 = scmp.lt.u32.totalorder %s562_s27, %s693_s5 }
 0x245   :  { %p568_p9 = pnand %p566_p8, %p563_p7 }
 0x247   :  { %571 = shalt.err (!%p568_p9)
}
 0x248   :  { %390 = dma.vmem_to_hbm [thread:$0]  %s385_s4, 384, %s693_s5, [#allocation4], %s582_s0, %s582_s0, %s583_s17  }
 0x249   :  { %576 = dma.done.wait [#allocation4], 384  }
 0x24a   :  { %577 = vsyncadd [#allocation4], 4294966912 }
 0x24b   :  { %394 = vsyncpa [#allocation3], 1 }
 0x24c   :  { %395 = vsyncpa [#allocation6], 1 }
 0x24d   :  { %396 = vsyncpa [#allocation4], 1 }

</bundles_post_ra>
